<compile_context>
chip_gen: v6e
topology: v6e:2x2x1
jax: 0.10.0
libtpu: 0.0.40
codegen_flags: <defaults>
</compile_context>

<pallas_src>
import functools

import jax
import jax.numpy as jnp
from jax import lax
from jax.experimental import pallas as pl
from jax.experimental.pallas import tpu as pltpu


def _round_up(x, m):
    return ((x + m - 1) // m) * m


def _ctx_embed_kernel(seed_ref, sid_ref, ptab_ref, out_ref, *, p, training, P, V):
    """One grid step: embed (and dropout) a block of Rb*P tokens.

    seed_ref : (1,)  int32 in SMEM (scalar-prefetched dropout seed)
    sid_ref  : (Rb, P) int32 ids, with per-lane-group offset g*V pre-added
    ptab_ref : (P*V, P*E)    block-diagonal packed table kron(eye(P), table)
    out_ref  : (Rb, P*E)     lane-dense output slab (P tokens per row)
    """
    Rb, PE = out_ref.shape
    K = P * V

    sid = sid_ref[...]                                            # (Rb, P)
    col = lax.broadcasted_iota(jnp.int32, (Rb, K), 1)             # (Rb, P*V)

    # One-hot in f32 (v7x MXU has no integer path).  The P lane-groups hit
    # disjoint column ranges, so a simple sum assembles the full one-hot.
    oh = jnp.zeros((Rb, K), jnp.float32)
    for g in range(P):                                            # static, P <= 4
        oh = oh + (sid[:, g:g + 1] == col).astype(jnp.float32)

    # Single MXU pass produces the lane-dense (Rb, 128) slab directly.
    x = jnp.dot(oh, ptab_ref[...].astype(jnp.float32),
                precision=jax.lax.Precision.HIGHEST,
                preferred_element_type=jnp.float32)               # (Rb, P*E)

    if training and p >= 1.0:
        x = jnp.zeros_like(x)                                     # nn.Dropout(p=1)
    elif training and p > 0.0:
        # Counter-based hash PRNG over the global output element index:
        # grid-invariant, unique per element, no pltpu.prng_* dependency.
        # TODO(synk): torch's exact dropout RNG stream is not reproducible;
        #             keep-probability / 1/(1-p) scaling semantics match.
        # TODO(synk): int32 counter overflows for > 2^31 output elements.
        # TODO(synk): on v7x, derive 4 keep bits per 32-bit hash (8-bit fields)
        #             to keep training mode HBM-bound rather than VALU-bound.
        ri = lax.broadcasted_iota(jnp.int32, (Rb, PE), 0)
        li = lax.broadcasted_iota(jnp.int32, (Rb, PE), 1)
        flat = (pl.program_id(0) * Rb + ri) * PE + li
        h = flat.astype(jnp.uint32) + (
            seed_ref[0].astype(jnp.uint32) * jnp.uint32(0x9E3779B9))
        h = h ^ (h >> 16)
        h = h * jnp.uint32(0x85EBCA6B)
        h = h ^ (h >> 13)
        h = h * jnp.uint32(0xC2B2AE35)
        h = h ^ (h >> 16)
        # Integer-threshold keep test on the top 24 bits (no float convert).
        r24 = (h >> 8).astype(jnp.int32)                          # [0, 2^24)
        thresh = jnp.int32(int(round(float(p) * float(1 << 24))))  # drop if <
        keep = r24 >= thresh
        x = jnp.where(keep, x * jnp.float32(1.0 / (1.0 - p)), jnp.float32(0.0))

    out_ref[...] = x.astype(out_ref.dtype)


def context_embedding(sequence, table, seed, *, p=0.1, training=False,
                      block_tokens=None):
    """Forward pass of ContextEmbedding.

    sequence: (B, S) int   token ids
    table:    (V, E) float embedding table (row 0 zeroed = padding_idx=0)
    seed:     int / (1,)   dropout seed (used only when training=True)
    returns:  (B, S, E)
    """
    B, S = sequence.shape
    V, E = table.shape
    N = B * S

    # Pack P tokens per 128-lane output row so stores / writeback are dense.
    P = (128 // E) if (E < 128 and 128 % E == 0) else 1
    PE = P * E

    # Tokens per grid step: aim for ~512 KiB of output per step (mem-bound
    # roofline guidance), with the sublane (row) dim a multiple of 8.
    row_align = 8 * P
    if block_tokens is None:
        block_tokens = max(1, (512 * 1024) // (E * table.dtype.itemsize))
    Tb = min(_round_up(N, row_align), _round_up(block_tokens, row_align))
    Rb = Tb // P
    num_blocks = (N + Tb - 1) // Tb
    Npad = num_blocks * Tb
    R = Npad // P

    # Flatten, clamp, pad with the padding token (table row 0 is the zero row).
    # TODO(synk): torch raises on out-of-range ids; here they are clamped.
    ids = jnp.clip(sequence.reshape(N).astype(jnp.int32), 0, V - 1)
    if Npad != N:
        ids = jnp.concatenate([ids, jnp.zeros((Npad - N,), jnp.int32)])
    # Column g of a row indexes diagonal block g of the packed table, which
    # writes lanes [g*E, (g+1)*E) of that output row.
    sid = ids.reshape(R, P) + (jnp.arange(P, dtype=jnp.int32) * V)[None, :]

    # Block-diagonal packed table (P*V, P*E); VMEM-resident for the whole grid.
    # TODO(synk): assumes context_size is small (true for ContextEmbedding);
    #             huge vocabularies would need an HBM row-gather path
    #             (memory_space=pl.ANY + manual make_async_copy) instead.
    ptab = jnp.kron(jnp.eye(P, dtype=table.dtype), table) if P > 1 else table

    seed = jnp.asarray(seed, jnp.int32).reshape(1)

    kernel = functools.partial(_ctx_embed_kernel, p=float(p),
                               training=bool(training), P=P, V=V)

    out = pl.pallas_call(
        kernel,
        out_shape=jax.ShapeDtypeStruct((R, PE), table.dtype),
        grid_spec=pltpu.PrefetchScalarGridSpec(
            num_scalar_prefetch=1,                     # just the (1,) seed
            grid=(num_blocks,),
            in_specs=[
                pl.BlockSpec((Rb, P), lambda i, seed_ref: (i, 0)),      # ids
                pl.BlockSpec((P * V, PE), lambda i, seed_ref: (0, 0)),  # table (resident)
            ],
            out_specs=pl.BlockSpec((Rb, PE), lambda i, seed_ref: (i, 0)),
        ),
        compiler_params=pltpu.CompilerParams(
            dimension_semantics=("parallel",)),        # 2x on v7x (2 TCs/chip)
    )(seed, sid, ptab)

    return out.reshape(Npad, E)[:N].reshape(B, S, E)


if __name__ == "__main__":
    key = jax.random.PRNGKey(0)
    k_tab, k_seq, k_seq2 = jax.random.split(key, 3)

    B, S = 2, 8                          # batch, sequence length
    context_size, embed_size = 16, 32
    p = 0.1

    # nn.Embedding(context_size, embed_size, padding_idx=0): zero row 0.
    table = jax.random.normal(k_tab, (context_size, embed_size), dtype=jnp.float32)
    table = table.at[0].set(0.0)

    sequence = jax.random.randint(k_seq, (B, S), 0, context_size, dtype=jnp.int32)
    seed = jnp.array([0], dtype=jnp.int32)

    # Eval mode (dropout = identity): match pure-JAX gather.
    out = jax.block_until_ready(
        context_embedding(sequence, table, seed, p=p, training=False))
    ref = jnp.take(table, sequence, axis=0)
    assert out.shape == (B, S, embed_size)
    assert out.dtype == jnp.float32
    assert jnp.allclose(out, ref, rtol=1e-2, atol=1e-6), "embedding gather mismatch"

    # Multi-block grid (forced small block) must also match.
    seq2 = jax.random.randint(k_seq2, (2, 64), 0, context_size, dtype=jnp.int32)
    out2 = jax.block_until_ready(
        context_embedding(seq2, table, seed, p=p, training=False, block_tokens=32))
    ref2 = jnp.take(table, seq2, axis=0)
    assert jnp.allclose(out2, ref2, rtol=1e-2, atol=1e-6), "multi-block gather mismatch"

    # Training mode: every element must be 0 (dropped) or ref/(1-p) (kept).
    out_tr = jax.block_until_ready(
        context_embedding(sequence, table, seed, p=p, training=True))
    scaled = ref / (1.0 - p)
    ok = (jnp.isclose(out_tr, 0.0, atol=1e-6)
          | jnp.isclose(out_tr, scaled, rtol=1e-2, atol=1e-6))
    assert bool(jnp.all(ok)), "dropout output must be 0 or scaled embedding"

    # p = 1.0 must give all zeros (matches nn.Dropout(p=1)), no divide-by-zero.
    out_p1 = jax.block_until_ready(
        context_embedding(sequence, table, seed, p=1.0, training=True))
    assert bool(jnp.all(out_p1 == 0.0)), "p=1 dropout must zero everything"

    print("KERNEL_OK")
</pallas_src>

<mosaic_0001>
module attributes {stable_mosaic.version = 11 : i64} {
  func.func @_ctx_embed_kernel(%arg0: i32, %arg1: memref<1xi32, #tpu.memory_space<smem>>, %arg2: memref<8x4xi32, #tpu.memory_space<vmem>>, %arg3: memref<64x128xf32, #tpu.memory_space<vmem>>, %arg4: memref<8x128xf32, #tpu.memory_space<vmem>>) attributes {dimension_semantics = [#tpu.dimension_semantics<parallel>], iteration_bounds = array<i64: 1>, scalar_prefetch = 1 : i64, scratch_operands = 0 : i64, tpu.core_type = #tpu.core_type<tc>, window_params = [{transform_indices = @transform_0, window_bounds = array<i64: 8, 4>}, {pipeline_mode = #tpu.pipeline_mode<synchronous>, transform_indices = @transform_1, window_bounds = array<i64: 64, 128>}, {transform_indices = @transform_2, window_bounds = array<i64: 8, 128>}]} {
    %c0 = arith.constant 0 : index
    %c0_0 = arith.constant 0 : index
    %0 = vector.load %arg2[%c0, %c0_0] : memref<8x4xi32, #tpu.memory_space<vmem>>, vector<8x4xi32>
    %1 = tpu.iota {dimensions = array<i32: 1>} : vector<8x64xi32>
    %cst = arith.constant 0.000000e+00 : f32
    %2 = vector.broadcast %cst : f32 to vector<8x64xf32>
    %3 = vector.extract_strided_slice %0 {offsets = [0, 0], sizes = [8, 1], strides = [1, 1]} : vector<8x4xi32> to vector<8x1xi32>
    %4 = vector.broadcast %3 : vector<8x1xi32> to vector<8x64xi32>
    %5 = arith.cmpi eq, %4, %1 : vector<8x64xi32>
    %6 = arith.extui %5 : vector<8x64xi1> to vector<8x64xi32>
    %7 = arith.sitofp %6 : vector<8x64xi32> to vector<8x64xf32>
    %8 = arith.addf %2, %7 : vector<8x64xf32>
    %9 = vector.extract_strided_slice %0 {offsets = [0, 1], sizes = [8, 1], strides = [1, 1]} : vector<8x4xi32> to vector<8x1xi32>
    %10 = vector.broadcast %9 : vector<8x1xi32> to vector<8x64xi32>
    %11 = arith.cmpi eq, %10, %1 : vector<8x64xi32>
    %12 = arith.extui %11 : vector<8x64xi1> to vector<8x64xi32>
    %13 = arith.sitofp %12 : vector<8x64xi32> to vector<8x64xf32>
    %14 = arith.addf %8, %13 : vector<8x64xf32>
    %15 = vector.extract_strided_slice %0 {offsets = [0, 2], sizes = [8, 1], strides = [1, 1]} : vector<8x4xi32> to vector<8x1xi32>
    %16 = vector.broadcast %15 : vector<8x1xi32> to vector<8x64xi32>
    %17 = arith.cmpi eq, %16, %1 : vector<8x64xi32>
    %18 = arith.extui %17 : vector<8x64xi1> to vector<8x64xi32>
    %19 = arith.sitofp %18 : vector<8x64xi32> to vector<8x64xf32>
    %20 = arith.addf %14, %19 : vector<8x64xf32>
    %21 = vector.extract_strided_slice %0 {offsets = [0, 3], sizes = [8, 1], strides = [1, 1]} : vector<8x4xi32> to vector<8x1xi32>
    %22 = vector.broadcast %21 : vector<8x1xi32> to vector<8x64xi32>
    %23 = arith.cmpi eq, %22, %1 : vector<8x64xi32>
    %24 = arith.extui %23 : vector<8x64xi1> to vector<8x64xi32>
    %25 = arith.sitofp %24 : vector<8x64xi32> to vector<8x64xf32>
    %26 = arith.addf %20, %25 : vector<8x64xf32>
    %c0_1 = arith.constant 0 : index
    %c0_2 = arith.constant 0 : index
    %27 = vector.load %arg3[%c0_1, %c0_2] : memref<64x128xf32, #tpu.memory_space<vmem>>, vector<64x128xf32>
    %cst_3 = arith.constant dense<0.000000e+00> : vector<8x128xf32>
    %28 = tpu.matmul %26, %27, %cst_3 {dimension_numbers = #tpu.dot_dimension_numbers<[1], [0], [0], [1], [0, 0, 1, 1], [], []>, precision = #tpu.contract_precision<fp32>} : vector<8x64xf32>, vector<64x128xf32>, vector<8x128xf32> -> vector<8x128xf32>
    %c0_4 = arith.constant 0 : index
    %c0_5 = arith.constant 0 : index
    %29 = vector.load %arg4[%c0_4, %c0_5] : memref<8x128xf32, #tpu.memory_space<vmem>>, vector<8x128xf32>
    tpu.vector_store %arg4[%c0_4, %c0_5], %28 {strides = array<i32>} : memref<8x128xf32, #tpu.memory_space<vmem>>, vector<8x128xf32>,
    return
  }
  func.func @transform_0(%arg0: i32, %arg1: memref<1xi32, #tpu.memory_space<smem>>) -> (i32, i32) {
    %c0_i32 = arith.constant 0 : i32
    %c0_i32_0 = arith.constant 0 : i32
    return %arg0, %c0_i32 : i32, i32
  }
  func.func @transform_1(%arg0: i32, %arg1: memref<1xi32, #tpu.memory_space<smem>>) -> (i32, i32) {
    %c0_i32 = arith.constant 0 : i32
    %c0_i32_0 = arith.constant 0 : i32
    %c0_i32_1 = arith.constant 0 : i32
    return %c0_i32, %c0_i32_0 : i32, i32
  }
  func.func @transform_2(%arg0: i32, %arg1: memref<1xi32, #tpu.memory_space<smem>>) -> (i32, i32) {
    %c0_i32 = arith.constant 0 : i32
    %c0_i32_0 = arith.constant 0 : i32
    return %arg0, %c0_i32 : i32, i32
  }
}

</mosaic_0001>

<bundles_post_ra>
// kernel: tpu_custom_call.1
= control target key start
LH: loop header
LB: loop body
LE: loop exit
PB: predicated region body
PF: predicated region fallthrough
CT: control target
= control target key end

     0   :  { %9 = vsyncpa [#allocation5], 0  ;;  %s1084_s0 = inlined_call_operand.<no memory space> [shape: s32[1], index: 0, kind: input, shape index: {}]   ;;  %s1085_s1 = inlined_call_operand.vmem [shape: s32[8,4], index: 1, kind: input, shape index: {}]   ;;  %s1086_s2 = inlined_call_operand.hbm [shape: f32[64,128], index: 2, kind: input, shape index: {}]   ;;  %s1087_s3 = inlined_call_operand.hbm [shape: f32[8,128], index: 3, kind: output, shape index: {}]  }
   0x1   :  { %10 = vsyncpa [#allocation6], 0  ;;  %s855_s12 = smov [#allocation4]  }
   0x2   :  { %s18_s13 = sshll.u32 %s855_s12, 4  ;;  %s19_s13 = int_to_ptr.vmem [resolvable:$true] %s18_s13 }
   0x3   :  { %s819_s14 = scalar_lea.vmem %s19_s13, 1024  ;;  %p824_p1 = scmp.lt.s32.totalorder %s19_s13, %s19_s13 }
   0x4   :  { %p820_p0 = scmp.ne.s32.totalorder %s19_s13, %s819_s14  ;;  %p825_p2 = scmp.lt.s32.totalorder %s819_s14, %s819_s14 }
   0x6   :  { %p826_p3 = por %p825_p2, %p824_p1 }
   0x8   :  { %p827_p4 = pnand %p826_p3, %p820_p0 }
   0xa   :  { %830 = shalt.err (!%p827_p4)
}
   0xb   :  { %s856_s0 = smov 128   ;;  %s857_s15 = smov 8  }
   0xc   :  { %24 = dma.hbm_to_vmem [thread:$0]  %s1086_s2, 1024, %s19_s13, [#allocation5], %s856_s0, %s856_s0, %s857_s15  }
   0xd   :  { %851 = dma.done.wait [#allocation5], 1024  }
   0xe   :  { %852 = vsyncadd [#allocation5], 4294966272  ;;  %v858_v0 = vmov 0   ;;  %v859_v1 = vmov 2   ;;  %v860_v2 = vmov 0.0   ;;  %v28_v3 = vld [vmem:[%s1085_s1] sm:$0xff]  ;;  %v29_v54 = vlaneseq }
   0xf   :  { %806 = vset.pattern.permute.xlu0 %v858_v0  ;;  %808 = vset.pattern.permute.xlu1 %v859_v1  ;;  %v66_v4 = vld [vmem:[#allocation4 + $0x38] sm:$0xff]  ;;  %v65_v5 = vld [vmem:[#allocation4 + $0x30] sm:$0xff]  ;;  %v64_v8 = vld [vmem:[#allocation4 + $0x28] sm:$0xff]  ;;  %v861_v24 = vmov 1   ;;  %v862_v25 = vmov 3   ;;  %vm863_vm0 = vmmov 0  }
  0x10   :  { %701 = vmatprep.subr.mxu1 %v860_v2  ;;  %682 = vmatprep.subr.mxu0 %v860_v2  ;;  %v893_v6 = vand.u32 4294901760, %v66_v4  ;;  %v895_v7 = vand.u32 4294901760, %v65_v5  ;;  %v63_v9 = vld [vmem:[#allocation4 + $0x20] sm:$0xff]  ;;  %v62_v10 = vld [vmem:[#allocation4 + $0x18] sm:$0xff]  ;;  %v897_v11 = vand.u32 4294901760, %v64_v8  ;;  %v61_v14 = vld [vmem:[#allocation4 + $0x10] sm:$0xff] }
  0x11   :  { %32 = vperm.xlu0 %806, %v28_v3   ;;  %46 = vperm.xlu1 %808, %v28_v3   ;;  %v899_v12 = vand.u32 4294901760, %v63_v9  ;;  %v901_v13 = vand.u32 4294901760, %v62_v10  ;;  %v60_v15 = vld [vmem:[#allocation4 + $0x8] sm:$0xff]  ;;  %v910_v18 = vand.u32 4294901760, %v61_v14  ;;  %v59_v20 = vld [vmem:[#allocation4] sm:$0xff]  ;;  %v30_v55 = vand.u32 127, %v29_v54 }
  0x12   :  { %v904_v16 = vsub.f32 %v66_v4, %v893_v6  ;;  %v907_v17 = vsub.f32 %v65_v5, %v895_v7  ;;  %683 = vmatpush3.msra.mxu0 %v893_v6  ;;  %v912_v19 = vand.u32 4294901760, %v60_v15  ;;  %v915_v21 = vsub.f32 %v64_v8, %v897_v11  ;;  %717 = vmatprep.mubr.msk.f32.mxu1 %vm863_vm0, %v860_v2  ;;  %s864_s1 = smov [#allocation7]  }
  0x13   :  { %v918_v22 = vsub.f32 %v63_v9, %v899_v12  ;;  %v921_v23 = vsub.f32 %v62_v10, %v901_v13  ;;  %684 = vmatprep.subr.mxu0 %v860_v2  ;;  %v927_v28 = vsub.f32 %v61_v14, %v910_v18  ;;  %v931_v31 = vand.u32 4294901760, %v59_v20  ;;  %698 = vmatprep.mubr.msk.f32.mxu0 %vm863_vm0, %v860_v2  ;;  %s615_s2 = sshll.u32 %s864_s1, 4  ;;  %s616_s2 = int_to_ptr.vmem [resolvable:$true] %s615_s2 }
  0x14   :  { %v173_v26 = vand.u32 4294901760, %v904_v16  ;;  %v180_v27 = vand.u32 4294901760, %v907_v17  ;;  %v187_v29 = vand.u32 4294901760, %v915_v21  ;;  %685 = vmatpush3.msra.mxu0 %v895_v7  ;;  %v942_v35 = vsub.f32 %v60_v15, %v912_v19  ;;  %s831_s20 = scalar_lea.vmem %s616_s2, 128  ;;  %p836_p6 = scmp.lt.s32.totalorder %s616_s2, %s616_s2 }
  0x15   :  { %807 = vset.pattern.permute.xlu0 %v861_v24  ;;  %809 = vset.pattern.permute.xlu1 %v862_v25  ;;  %v194_v30 = vand.u32 4294901760, %v918_v22  ;;  %v201_v34 = vand.u32 4294901760, %v921_v23  ;;  %v208_v37 = vand.u32 4294901760, %v927_v28  ;;  %v954_v41 = vsub.f32 %v59_v20, %v931_v31  ;;  %p832_p5 = scmp.ne.s32.totalorder %s616_s2, %s831_s20  ;;  %p837_p7 = scmp.lt.s32.totalorder %s831_s20, %s831_s20 }
  0x16   :  { %39 = vperm.xlu0 %807, %v28_v3   ;;  %53 = vperm.xlu1 %809, %v28_v3   ;;  %v174_v32 = vsub.f32 %v904_v16, %v173_v26  ;;  %v181_v33 = vsub.f32 %v907_v17, %v180_v27  ;;  %v188_v36 = vsub.f32 %v915_v21, %v187_v29  ;;  %v215_v44 = vand.u32 4294901760, %v942_v35 }
  0x17   :  { %686 = vmatprep.subr.mxu0 %v860_v2  ;;  %v195_v40 = vsub.f32 %v918_v22, %v194_v30  ;;  %v202_v43 = vsub.f32 %v921_v23, %v201_v34  ;;  %v209_v46 = vsub.f32 %v927_v28, %v208_v37  ;;  %v222_v47 = vand.u32 4294901760, %v954_v41  ;;  %p838_p8 = por %p837_p7, %p836_p6 }
  0x18   :  { %v175_v38 = vand.u32 4294901760, %v174_v32  ;;  %v182_v39 = vand.u32 4294901760, %v181_v33  ;;  %687 = vmatpush3.msra.mxu0 %v897_v11  ;;  %v189_v42 = vand.u32 4294901760, %v188_v36  ;;  %v216_v49 = vsub.f32 %v942_v35, %v215_v44 }
  0x19   :  { %688 = vmatprep.subr.mxu0 %v860_v2  ;;  %v196_v45 = vand.u32 4294901760, %v195_v40  ;;  %v203_v48 = vand.u32 4294901760, %v202_v43  ;;  %v210_v50 = vand.u32 4294901760, %v209_v46  ;;  %v223_v51 = vsub.f32 %v954_v41, %v222_v47  ;;  %p839_p9 = pnand %p838_p8, %p832_p5 }
  0x1a   :  { %810 = vset.pattern.permute.xlu0 %v862_v25  ;;  %702 = vmatpush3.msra.mxu1 %v175_v38  ;;  %v217_v52 = vand.u32 4294901760, %v216_v49  ;;  %vm67_vm5 = vcmask 523264  }
  0x1b   :  { %689 = vmatpush3.msra.mxu0 %v899_v12  ;;  %703 = vmatprep.subr.mxu1 %v860_v2  ;;  %v224_v53 = vand.u32 4294901760, %v223_v51 }
  0x1c   :  { %690 = vmatprep.subr.mxu0 %v860_v2  ;;  %704 = vmatpush3.msra.mxu1 %v182_v39 }
  0x1d   :  { %705 = vmatprep.subr.mxu1 %v860_v2  ;;  %691 = vmatpush3.msra.mxu0 %v901_v13 }
  0x1e   :  { %706 = vmatpush3.msra.mxu1 %v189_v42  ;;  %692 = vmatprep.subr.mxu0 %v860_v2 }
  0x1f   :  { %707 = vmatprep.subr.mxu1 %v860_v2  ;;  %693 = vmatpush3.msra.mxu0 %v910_v18 }
  0x20   :  { %708 = vmatpush3.msra.mxu1 %v196_v45  ;;  %694 = vmatprep.subr.mxu0 %v860_v2 }
  0x21   :  { %709 = vmatprep.subr.mxu1 %v860_v2  ;;  %695 = vmatpush3.msra.mxu0 %v912_v19 }
  0x22   :  { %710 = vmatpush3.msra.mxu1 %v203_v48  ;;  %696 = vmatprep.subr.mxu0 %v860_v2 }
  0x23   :  { %711 = vmatprep.subr.mxu1 %v860_v2  ;;  %697 = vmatpush3.msra.mxu0 %v931_v31 }
  0x24   :  { %712 = vmatpush3.msra.mxu1 %v210_v50  ;;  %720 = vmatprep.subr.mxu0 %v860_v2 }
  0x25   :  { %713 = vmatprep.subr.mxu1 %v860_v2 }
  0x26   :  { %714 = vmatpush3.msra.mxu1 %v217_v52 }
  0x27   :  { %715 = vmatprep.subr.mxu1 %v860_v2 }
  0x28   :  { %716 = vmatpush3.msra.mxu1 %v224_v53 }
  0x29   :  { %739 = vmatprep.subr.mxu1 %v860_v2 }
  0x8c   :  { %v33_v56 = vpop.permute.xlu0 %32  ;;  %v47_v57 = vpop.permute.xlu1 %46 }
  0x8d   :  { %vm34_vm1 = vcmp.eq.s32.totalorder %v33_v56, %v30_v55  ;;  %vm48_vm2 = vcmp.eq.s32.totalorder %v47_v57, %v30_v55 }
  0x8e   :  { %v624_v60 = vsel %vm34_vm1, 1.0, %v860_v2  ;;  %v626_v63 = vsel %vm48_vm2, 1.0, %v860_v2 }
  0x91   :  { %v40_v58 = vpop.permute.xlu0 %39  ;;  %v54_v59 = vpop.permute.xlu1 %53 }
  0x92   :  { %vm41_vm3 = vcmp.eq.s32.totalorder %v40_v58, %v30_v55  ;;  %vm55_vm4 = vcmp.eq.s32.totalorder %v54_v59, %v30_v55 }
  0x93   :  { %v625_v61 = vsel %vm41_vm3, 1.0, %v860_v2  ;;  %v627_v0 = vsel %vm55_vm4, 1.0, %v860_v2 }
  0x94   :  { %v44_v62 = vadd.f32 %v625_v61, %v624_v60 }
  0x96   :  { %v51_v1 = vadd.f32 %v626_v63, %v44_v62 }
  0x98   :  { %v58_v3 = vadd.f32 %v627_v0, %v51_v1 }
  0x9a   :  { %v69_v4 = vsel %vm67_vm5, %v58_v3, 0 }
  0x9b   :  { %v997_v5 = vand.u32 4294901760, %v69_v4 }
  0x9d   :  { %v145_v8 = vsub.f32 %v69_v4, %v997_v5  ;;  %718 = vmatmul.mubr.f32.vlgmr.msra.gmra.mxu1 %v997_v5 }
  0x9e   :  { %740 = vmatpush3.msra.mxu1 %v893_v6  ;;  %755 = vmatprep.mubr.msk.f32.mxu1 %vm863_vm0, %v860_v2 }
  0x9f   :  { %741 = vmatprep.subr.mxu1 %v860_v2  ;;  %v146_v9 = vand.u32 4294901760, %v145_v8 }
  0xa0   :  { %742 = vmatpush3.msra.mxu1 %v895_v7 }
  0xa1   :  { %743 = vmatprep.subr.mxu1 %v860_v2  ;;  %v147_v10 = vsub.f32 %v145_v8, %v146_v9 }
  0xa2   :  { %744 = vmatpush3.msra.mxu1 %v897_v11 }
  0xa3   :  { %745 = vmatprep.subr.mxu1 %v860_v2  ;;  %v148_v14 = vand.u32 4294901760, %v147_v10 }
  0xa4   :  { %746 = vmatpush3.msra.mxu1 %v899_v12 }
  0xa5   :  { %747 = vmatprep.subr.mxu1 %v860_v2  ;;  %699 = vmatmul.mubr.f32.vlgmr.msra.gmra.mxu0 %v148_v14 }
  0xa6   :  { %721 = vmatpush3.msra.mxu0 %v904_v16  ;;  %748 = vmatpush3.msra.mxu1 %v901_v13 }
  0xa7   :  { %722 = vmatprep.subr.mxu0 %v860_v2  ;;  %749 = vmatprep.subr.mxu1 %v860_v2 }
  0xa8   :  { %723 = vmatpush3.msra.mxu0 %v907_v17  ;;  %750 = vmatpush3.msra.mxu1 %v910_v18 }
  0xa9   :  { %724 = vmatprep.subr.mxu0 %v860_v2  ;;  %751 = vmatprep.subr.mxu1 %v860_v2 }
  0xaa   :  { %725 = vmatpush3.msra.mxu0 %v915_v21  ;;  %752 = vmatpush3.msra.mxu1 %v912_v19 }
  0xab   :  { %726 = vmatprep.subr.mxu0 %v860_v2  ;;  %753 = vmatprep.subr.mxu1 %v860_v2 }
  0xac   :  { %727 = vmatpush3.msra.mxu0 %v918_v22  ;;  %754 = vmatpush3.msra.mxu1 %v931_v31 }
  0xad   :  { %728 = vmatprep.subr.mxu0 %v860_v2  ;;  %756 = vmatmul.mubr.f32.vlgmr.msra.gmra.mxu1 %v146_v9 }
  0xae   :  { %777 = vmatprep.subr.mxu1 %v860_v2  ;;  %729 = vmatpush3.msra.mxu0 %v921_v23 }
  0xaf   :  { %778 = vmatpush3.msra.mxu1 %v893_v6  ;;  %730 = vmatprep.subr.mxu0 %v860_v2 }
  0xb0   :  { %779 = vmatprep.subr.mxu1 %v860_v2  ;;  %731 = vmatpush3.msra.mxu0 %v927_v28 }
  0xb1   :  { %780 = vmatpush3.msra.mxu1 %v895_v7  ;;  %732 = vmatprep.subr.mxu0 %v860_v2 }
  0xb2   :  { %781 = vmatprep.subr.mxu1 %v860_v2  ;;  %733 = vmatpush3.msra.mxu0 %v942_v35 }
  0xb3   :  { %782 = vmatpush3.msra.mxu1 %v897_v11  ;;  %734 = vmatprep.subr.mxu0 %v860_v2 }
  0xb4   :  { %783 = vmatprep.subr.mxu1 %v860_v2  ;;  %735 = vmatpush3.msra.mxu0 %v954_v41 }
  0xb5   :  { %736 = vmatprep.mubr.msk.f32.mxu0 %vm863_vm0, %v860_v2  ;;  %784 = vmatpush3.msra.mxu1 %v899_v12 }
  0xb6   :  { %737 = vmatmul.mubr.f32.vlgmr.msra.gmra.mxu0 %v145_v8  ;;  %758 = vmatprep.subr.mxu0 %v860_v2 }
  0xb7   :  { %785 = vmatprep.subr.mxu1 %v860_v2  ;;  %759 = vmatpush3.msra.mxu0 %v173_v26 }
  0xb8   :  { %786 = vmatpush3.msra.mxu1 %v901_v13  ;;  %760 = vmatprep.subr.mxu0 %v860_v2 }
  0xb9   :  { %787 = vmatprep.subr.mxu1 %v860_v2  ;;  %761 = vmatpush3.msra.mxu0 %v180_v27 }
  0xba   :  { %788 = vmatpush3.msra.mxu1 %v910_v18  ;;  %762 = vmatprep.subr.mxu0 %v860_v2 }
  0xbb   :  { %789 = vmatprep.subr.mxu1 %v860_v2  ;;  %763 = vmatpush3.msra.mxu0 %v187_v29 }
  0xbc   :  { %790 = vmatpush3.msra.mxu1 %v912_v19  ;;  %764 = vmatprep.subr.mxu0 %v860_v2 }
  0xbd   :  { %791 = vmatprep.subr.mxu1 %v860_v2  ;;  %765 = vmatpush3.msra.mxu0 %v194_v30 }
  0xbe   :  { %792 = vmatpush3.msra.mxu1 %v931_v31  ;;  %793 = vmatprep.mubr.msk.f32.mxu1 %vm863_vm0, %v860_v2 }
  0xbf   :  { %766 = vmatprep.subr.mxu0 %v860_v2  ;;  %794 = vmatmul.mubr.f32.vlgmr.msra.gmra.mxu1 %v997_v5 }
  0xc0   :  { %767 = vmatpush3.msra.mxu0 %v201_v34  ;;  %774 = vmatprep.mubr.msk.f32.mxu0 %vm863_vm0, %v860_v2 }
  0xc1   :  { %768 = vmatprep.subr.mxu0 %v860_v2 }
  0xc2   :  { %769 = vmatpush3.msra.mxu0 %v208_v37 }
  0xc3   :  { %770 = vmatprep.subr.mxu0 %v860_v2 }
  0xc4   :  { %771 = vmatpush3.msra.mxu0 %v215_v44 }
  0xc5   :  { %772 = vmatprep.subr.mxu0 %v860_v2 }
  0xc6   :  { %773 = vmatpush3.msra.mxu0 %v222_v47 }
  0xc7   :  { %775 = vmatmul.mubr.f32.vlgmr.msra.gmra.mxu0 %v997_v5 }
 0x15d   :  { %v261_v6 = vpop.f32.mrf.mxu1 }
 0x15f   :  { %v719_v7 = vpop.f32.mrf.mxu1 }
 0x165   :  { %v150_v11 = vpop.f32.mrf.mxu0 }
 0x166   :  { %v262_v19 = vadd.f32 %v261_v6, %v150_v11 }
 0x167   :  { %v700_v12 = vpop.f32.mrf.mxu0 }
 0x16d   :  { %v430_v13 = vpop.f32.mrf.mxu1 }
 0x16f   :  { %v757_v15 = vpop.f32.mrf.mxu1 }
 0x176   :  { %v349_v16 = vpop.f32.mrf.mxu0 }
 0x177   :  { %v350_v21 = vadd.f32 %v349_v16, %v262_v19 }
 0x178   :  { %v738_v17 = vpop.f32.mrf.mxu0 }
 0x179   :  { %v431_v22 = vadd.f32 %v430_v13, %v350_v21 }
 0x17f   :  { %v604_v18 = vpop.f32.mrf.mxu1 }
 0x181   :  { %v795_v20 = vpop.f32.mrf.mxu1 }
 0x187   :  { %v525_v23 = vpop.f32.mrf.mxu0 }
 0x188   :  { %v526_v2 = vadd.f32 %v525_v23, %v431_v22 }
 0x189   :  { %v776_v24 = vpop.f32.mrf.mxu0 }
 0x18a   :  { %v605_v25 = vadd.f32 %v604_v18, %v526_v2 }
 0x18c   :  { %608 = vst [vmem:[#allocation7] sm:$0xff] %v605_v25 }
 0x18d   :  { %842 = shalt.err (!%p839_p9)
}
 0x18e   :  { %618 = dma.vmem_to_hbm [thread:$0]  %s616_s2, 128, %s1087_s3, [#allocation6]  }
 0x18f   :  { %853 = dma.done.wait [#allocation6], 128  }
 0x190   :  { %854 = vsyncadd [#allocation6], 4294967168 }
 0x191   :  { %622 = vsyncpa [#allocation5], 1 }
 0x192   :  { %623 = vsyncpa [#allocation6], 1 }

</bundles_post_ra>
